<compile_context>
chip_gen: v7x
topology: tpu7x:2x2x1
jax: 0.10.0
libtpu: 0.0.40
codegen_flags: <defaults>
</compile_context>

<pallas_src>
import jax
import jax.numpy as jnp
from jax.experimental import pallas as pl
from jax.experimental.pallas import tpu as pltpu

REPEATS = 9  # cat((x,y),1)=3 copies, y=2 copies, z=4 copies -> 3+2+4 = 9


def _replicate_kernel(x_ref, o_ref):
    # x_ref: (1, 1, chunk)        -- lane-dense slice of one sample
    # o_ref: (1, REPEATS, chunk)  -- the 9 channel-copies of that slice
    # One dense store of the whole block (sublane broadcast), not 9 masked
    # single-row stores.
    o_ref[...] = jnp.broadcast_to(x_ref[...], o_ref.shape)


def _vmem_budget_bytes():
    """Generation-aware per-block VMEM budget (with compiler headroom)."""
    try:
        cap = int(pltpu.get_tpu_info().vmem_capacity_bytes)
    except Exception:
        cap = 64 << 20  # conservative fallback (v7x per-core physical VMEM)
    # v5e/v6e (128 MiB) -> 32 MiB budget; v7x (64 MiB) -> 16 MiB budget.
    return min(cap // 4, 32 << 20), min(cap // 2, 64 << 20)


def _pick_chunk(chw, itemsize, vmem_budget):
    """Largest 128-multiple divisor of chw whose blocks fit the VMEM budget."""
    if chw % 128 != 0:
        # Full-extent block is always legal regardless of (8,128) divisibility.
        return chw
    # Per grid cell, double-buffered: input tile (1 row, padded to 8 sublanes)
    # + output tile (REPEATS rows, padded to 16 sublanes), `chunk` lanes each.
    rows = 8 + 16
    max_elems = max(vmem_budget // (2 * rows * itemsize), 128)
    m = chw // 128
    best = 128
    for d in range(1, m + 1):
        if m % d == 0 and 128 * d <= max_elems:
            best = 128 * d
    return best


def concat_model(x):
    """Implements Model.forward: x repeated 9x along the channel dim."""
    N, C, H, W = x.shape
    chw = C * H * W
    itemsize = jnp.dtype(x.dtype).itemsize

    budget, vmem_limit = _vmem_budget_bytes()
    chunk = _pick_chunk(chw, itemsize, budget)
    n_chunks = chw // chunk

    # Lane-dense input view; dummy middle dim keeps the block's last-two dims
    # (1, chunk) legal (1 == full extent of that axis).
    x_flat = x.reshape(N, 1, chw)

    out_flat = pl.pallas_call(
        _replicate_kernel,
        out_shape=jax.ShapeDtypeStruct((N, REPEATS, chw), x.dtype),
        grid_spec=pltpu.PrefetchScalarGridSpec(
            num_scalar_prefetch=0,
            grid=(N, n_chunks),
            in_specs=[pl.BlockSpec((1, 1, chunk), lambda n, c: (n, 0, c))],
            out_specs=pl.BlockSpec((1, REPEATS, chunk), lambda n, c: (n, 0, c)),
        ),
        compiler_params=pltpu.CompilerParams(
            dimension_semantics=("parallel", "parallel"),
            vmem_limit_bytes=vmem_limit,
        ),
        cost_estimate=pl.CostEstimate(
            flops=0,
            transcendentals=0,
            bytes_accessed=(1 + REPEATS) * N * chw * itemsize,
        ),
    )(x_flat)

    # (N, REPEATS, C*H*W) -> (N, REPEATS*C, H, W): memory order already matches
    # the cat((x,y,z),1) result, so this reshape is metadata-only.
    return out_flat.reshape(N, REPEATS * C, H, W)


def concat_ref(x):
    """Pure-JAX reference mirroring the PyTorch forward."""
    y = jnp.concatenate((x, x), axis=1)
    a = jnp.concatenate((x, y), axis=1)
    z = jnp.concatenate((y, y), axis=1)
    return jnp.concatenate((a, y, z), axis=1)


if __name__ == "__main__":
    key = jax.random.PRNGKey(0)
    x = jax.random.normal(key, (2, 4, 16, 16), dtype=jnp.float32)

    out = jax.block_until_ready(concat_model(x))

    ref = concat_ref(x)
    assert out.shape == ref.shape == (2, 36, 16, 16), out.shape
    assert jnp.allclose(out, ref), "mismatch vs reference"

    print("KERNEL_OK")
</pallas_src>

<mosaic_0001>
module attributes {stable_mosaic.version = 11 : i64} {
  func.func @_replicate_kernel(%arg0: i32, %arg1: i32, %arg2: memref<1x1x1024xf32, #tpu.memory_space<vmem>>, %arg3: memref<1x9x1024xf32, #tpu.memory_space<vmem>>) attributes {dimension_semantics = [#tpu.dimension_semantics<parallel>, #tpu.dimension_semantics<parallel>], iteration_bounds = array<i64: 2, 1>, scalar_prefetch = 0 : i64, scratch_operands = 0 : i64, tpu.core_type = #tpu.core_type<tc>, window_params = [{transform_indices = @transform_0, window_bounds = array<i64: 1, 1, 1024>}, {transform_indices = @transform_1, window_bounds = array<i64: 1, 9, 1024>}]} {
    %c0 = arith.constant 0 : index
    %c0_0 = arith.constant 0 : index
    %c0_1 = arith.constant 0 : index
    %0 = vector.load %arg2[%c0, %c0_0, %c0_1] : memref<1x1x1024xf32, #tpu.memory_space<vmem>>, vector<1x1x1024xf32>
    %1 = vector.shape_cast %0 : vector<1x1x1024xf32> to vector<1x1x1024xf32>
    %2 = vector.broadcast %1 : vector<1x1x1024xf32> to vector<1x9x1024xf32>
    %c0_2 = arith.constant 0 : index
    %c0_3 = arith.constant 0 : index
    %c0_4 = arith.constant 0 : index
    %3 = vector.load %arg3[%c0_2, %c0_3, %c0_4] : memref<1x9x1024xf32, #tpu.memory_space<vmem>>, vector<1x9x1024xf32>
    tpu.vector_store %arg3[%c0_2, %c0_3, %c0_4], %2 {strides = array<i32>} : memref<1x9x1024xf32, #tpu.memory_space<vmem>>, vector<1x9x1024xf32>,
    return
  }
  func.func @transform_0(%arg0: i32, %arg1: i32) -> (i32, i32, i32) {
    %c0_i32 = arith.constant 0 : i32
    %c0_i32_0 = arith.constant 0 : i32
    return %arg0, %c0_i32, %arg1 : i32, i32, i32
  }
  func.func @transform_1(%arg0: i32, %arg1: i32) -> (i32, i32, i32) {
    %c0_i32 = arith.constant 0 : i32
    %c0_i32_0 = arith.constant 0 : i32
    return %arg0, %c0_i32, %arg1 : i32, i32, i32
  }
}

</mosaic_0001>

<bundles_post_ra>
// kernel: tpu_custom_call.1
= control target key start
LH: loop header
LB: loop body
LE: loop exit
PB: predicated region body
PF: predicated region fallthrough
CT: control target
= control target key end

     0   :  { %6 = vsyncpa [#allocation3], 0  ;;  %s604_s0 = inlined_call_operand.hbm [shape: f32[2,1,1024], index: 0, kind: input, shape index: {}]   ;;  %s605_s1 = inlined_call_operand.vmem [shape: f32[2,9,1024], index: 1, kind: output, shape index: {}]  }
   0x1   :  { %8 = vsyncpa [#allocation3 + $0x1], 0  ;;  %s479_s6 = smov 0   ;;  %s481_s7 = smov 0  }
   0x2   :  { %s483_s8 = smov 0   ;;  %s485_s9 = smov 0  }
   0x3   :  { %s487_s10 = smov 0   ;;  %s489_s11 = smov 0  }
   0x4 LB: > { %s316_s12 = sadd.s32 4294967295, %s466_s11   ;;  %s26_s13 = sadd.s32 1, %s462_s10  ;;  %s466_s11 = sphi %s489_s11, %s14_s11   ;;  %s462_s10 = sphi %s487_s10, %s615_s10   ;;  %s458_s9 = sphi %s485_s9, %s614_s9   ;;  %s454_s8 = sphi %s483_s8, %s613_s8   ;;  %s450_s7 = sphi %s481_s7, %s612_s7   ;;  %s446_s6 = sphi %s479_s6, %s611_s6  }
   0x5   : > { %p28_p0 = scmp.ge.s32.totalorder %s26_s13, 2  ;;  %s35_s14 = sadd.s32 1, %s454_s8 }
   0x6   : > { %p42_p1 = scmp.ne.s32.totalorder %s454_s8, %s450_s7  ;;  %p43_p2 = scmp.eq.s32.totalorder %s466_s11, 0 }
   0x7   : > { %s617_s13 = smov (%p28_p0, %s26_s13), 0  ;;  %p48_p4 = scmp.ne.s32.totalorder %s450_s7, %s446_s6 }
   0x8   : > { %p515_p3 = por %p43_p2, %p42_p1  ;;  %s30_s16 = ssub.s32 %s462_s10, %s617_s13 }
   0x9   : > { %p49_p5 = scmp.eq.s32.totalorder %s316_s12, 0  ;;  %p33_p6 = scmp.eq.s32.totalorder %s30_s16, 0 }
   0xa   : > { %p337_p8 = scmp.lt.s32.totalorder %s466_s11, 2  ;;  %s100_s19 = sand.u32 1, %s454_s8  }
   0xb   : > { %p522_p7 = por %p49_p5, %p48_p4  ;;  %s329_s20 = sshll.u32 %s462_s10, 7 }
   0xc   : > { %s528_s18 = scalar_select %p33_p6, %s454_s8, %s35_s14  }
   0xd   : > { %s320_s21 = sshll.u32 %s100_s19, 3  ;;  %s535_s24 = scalar_lea.hbm %s604_s0, %s329_s20 }
   0xe   : > { %s104_s25 = scalar_lea.vmem [#allocation2], %s320_s21  ;;  %p539_p9 = pnand %p337_p8, %p515_p3 }
   0xf   : > { %s114_s26 = sshll.u32 %s104_s25, 4  ;;  %s101_s28 = scalar_lea.sflag [#allocation3], %s100_s19  ;;  %s543_s26 = int_to_ptr.vmem [resolvable:$true] %s114_s26 }
  0x10   : > { %s386_s29 = scalar_lea.hbm %s535_s24, 128  ;;  %p388_p13 = pneg %p539_p9 }
  0x11   : > { %p387_p12 = scmp.ne.s32.totalorder %s535_s24, %s386_s29  ;;  %s391_s3 = scalar_lea.hbm %s604_s0, 256 }
  0x12   : > { %p392_p2 = scmp.lt.u32.totalorder %s535_s24, %s604_s0  ;;  %p393_p3 = scmp.lt.u32.totalorder %s391_s3, %s386_s29 }
  0x13   : > { %p389_p0 = pnand %p388_p13, %p387_p12  ;;  %p395_p5 = scmp.lt.u32.totalorder %s386_s29, %s535_s24 }
  0x14   : > { %p394_p4 = por %p393_p3, %p392_p2 }
  0x15   : > { %p390_p1 = pneg %p389_p0 }
  0x16   : > { %p396_p6 = por %p395_p5, %p394_p4 }
  0x18   : > { %p397_p8 = pnand %p396_p6, %p390_p1 }
  0x1a   : > { %400 = shalt.err (!%p397_p8)
}
  0x1b   : > { %s401_s6 = scalar_lea.vmem %s543_s26, 128  ;;  %s468_s12 = smov [#allocation2]  }
  0x1c   : > { %p402_p12 = scmp.ne.s32.totalorder %s543_s26, %s401_s6  ;;  %s406_s14 = sshll.u32 %s468_s12, 4  ;;  %s407_s14 = int_to_ptr.vmem [resolvable:$false] %s406_s14 }
  0x1d   : > { %s408_s15 = scalar_lea.vmem %s407_s14, 256  ;;  %p409_p11 = scmp.lt.s32.totalorder %s543_s26, %s407_s14 }
  0x1e   : > { %p404_p0 = pnand %p402_p12, %p388_p13  ;;  %p410_p2 = scmp.lt.s32.totalorder %s408_s15, %s401_s6 }
  0x20   : > { %p405_p10 = pneg %p404_p0  ;;  %p411_p3 = por %p410_p2, %p409_p11 }
  0x22   : > { %p412_p4 = pnand %p411_p3, %p405_p10 }
  0x24   : > { %415 = shalt.err (!%p412_p4)
}
  0x25   : > { %336 = dma.hbm_to_vmem [thread:$0]  (!%p539_p9), %s535_s24, 128, %s543_s26, %s101_s28  }
  0x26   : > { %p609_p1 = scmp.lt.s32.totalorder %s466_s11, 3  ;;  %p610_p5 = scmp.ge.s32.totalorder %s466_s11, 1 }
  0x28   : > { %p120_p13 = pnand %p610_p5, %p609_p1 }
  0x29   : > { %s125_s16 = sand.u32 (!%p120_p13), 1, %s450_s7  }
  0x2a   : > { %123 = sbr.rel (%p120_p13) target bundleno = 66 (0x42), region = 24  ;;  %s324_s19 = sshll.u32 (!%p120_p13), %s125_s16, 3 }
  0x2b   : > { %s126_s20 = scalar_lea.sflag (!%p120_p13), [#allocation3], %s125_s16  ;;  %s129_s21 = scalar_lea.vmem (!%p120_p13), [#allocation2], %s324_s19 }
  0x31   : > { %441 = dma.done.wait (%p522_p7), %s126_s20, 128  }
  0x32   : > { %443 = vsyncadd (%p522_p7), %s126_s20, 4294967168  ;;  %p154_p10 = scmp.lt.s32.totalorder %s458_s9, 1  ;;  %v165_v0 = vlaneseq  ;;  %v163_v10 = vld [vmem:[%s129_s21] sm:$0xff] }
  0x34   : > { %s619_s9 = smov (!%p154_p10, %s458_s9), 1  ;;  %v166_v1 = vshrl.u32 %v165_v0, 7 }
  0x35   : > { %s330_s22 = sshll.u32 %s619_s9, 7 }
  0x36   : > { %v167_v2 = vsub.s32 0, %v166_v1  ;;  %v171_v3 = vsub.s32 1, %v166_v1  ;;  %v175_v4 = vsub.s32 2, %v166_v1  ;;  %v179_v5 = vsub.s32 3, %v166_v1  ;;  %s161_s17 = scalar_lea.vmem %s605_s1, %s330_s22 }
  0x37   : > { %v183_v6 = vsub.s32 4, %v166_v1  ;;  %v187_v7 = vsub.s32 5, %v166_v1  ;;  %v191_v8 = vsub.s32 6, %v166_v1  ;;  %v195_v9 = vsub.s32 7, %v166_v1 }
  0x38   : > { %v168_v11 = vrot.slane %v163_v10, %v167_v2  ;;  %v172_v12 = vrot.slane %v163_v10, %v171_v3  ;;  %v176_v13 = vrot.slane %v163_v10, %v175_v4  ;;  %v180_v14 = vrot.slane %v163_v10, %v179_v5 }
  0x39   : > { %v184_v15 = vrot.slane %v163_v10, %v183_v6  ;;  %v188_v16 = vrot.slane %v163_v10, %v187_v7  ;;  %v192_v17 = vrot.slane %v163_v10, %v191_v8  ;;  %v196_v18 = vrot.slane %v163_v10, %v195_v9 }
  0x3a   : > { %205 = vst [vmem:[%s161_s17] sm:$0xff] %v168_v11  ;;  %213 = vst [vmem:[%s161_s17 + $0x40] sm:$0x1] %v168_v11 }
  0x3b   : > { %206 = vst [vmem:[%s161_s17 + $0x8] sm:$0xff] %v172_v12  ;;  %214 = vst [vmem:[%s161_s17 + $0x48] sm:$0x1] %v172_v12 }
  0x3c   : > { %207 = vst [vmem:[%s161_s17 + $0x10] sm:$0xff] %v176_v13  ;;  %215 = vst [vmem:[%s161_s17 + $0x50] sm:$0x1] %v176_v13 }
  0x3d   : > { %208 = vst [vmem:[%s161_s17 + $0x18] sm:$0xff] %v180_v14  ;;  %216 = vst [vmem:[%s161_s17 + $0x58] sm:$0x1] %v180_v14 }
  0x3e   : > { %209 = vst [vmem:[%s161_s17 + $0x20] sm:$0xff] %v184_v15  ;;  %217 = vst [vmem:[%s161_s17 + $0x60] sm:$0x1] %v184_v15 }
  0x3f   : > { %210 = vst [vmem:[%s161_s17 + $0x28] sm:$0xff] %v188_v16  ;;  %218 = vst [vmem:[%s161_s17 + $0x68] sm:$0x1] %v188_v16 }
  0x40   : > { %211 = vst [vmem:[%s161_s17 + $0x30] sm:$0xff] %v192_v17  ;;  %219 = vst [vmem:[%s161_s17 + $0x70] sm:$0x1] %v192_v17 }
  0x41   : > { %212 = vst [vmem:[%s161_s17 + $0x38] sm:$0xff] %v196_v18  ;;  %220 = vst [vmem:[%s161_s17 + $0x78] sm:$0x1] %v196_v18 }
  0x42 PF: > { %s14_s11 = sadd.s32 1, %s466_s11   ;;  %s611_s6 = smov %s450_s7 }
  0x43   : > { %p11_p7 = scmp.ge.s32.totalorder %s14_s11, 4   ;;  %s612_s7 = smov %s454_s8 }
  0x44   : > { %s613_s8 = smov %s528_s18  ;;  %s614_s9 = smov %s462_s10 }
  0x45   : > { %s615_s10 = smov %s617_s13  ;;  %13 = sbr.rel (!%p11_p7) target bundleno = 4 (0x4), region = 64 }
  0x4c   :  { %251 = vsyncpa [#allocation3], 1 }
  0x4d   :  { %253 = vsyncpa [#allocation3 + $0x1], 1 }

</bundles_post_ra>
